<compile_context>
chip_gen: v5e
topology: v5e:2x2
jax: 0.10.0
libtpu: 0.0.40
codegen_flags: <defaults>
</compile_context>

<pallas_src>
import jax
import jax.numpy as jnp
from jax import lax
from jax.experimental import pallas as pl
from jax.experimental.pallas import tpu as pltpu

_EPS = 1e-12  # torch.nn.functional.normalize default eps (clamp on the norm)


def _round_up(v, m):
    return ((v + m - 1) // m) * m


def _pick_tile_n(dim, cap, lo):
    """Tile for the class axis: multiple of 128, <= cap, divides the padded dim.

    Prefers a divisor of the 128-aligned dim (avoids a full pad copy of fc);
    falls back to padding up to a multiple of 512 if no divisor >= `lo` exists.
    """
    aligned = _round_up(dim, 128)
    if aligned <= cap:
        return aligned, aligned
    for t in range(cap, lo - 1, -128):
        if aligned % t == 0:
            return t, aligned
    return 512, _round_up(dim, 512)


def _pick_tile_k(dim, cap):
    """Tile for the contraction axis: largest multiple-of-128 divisor of the
    128-aligned dim that is <= cap (never pads beyond 128 alignment)."""
    aligned = _round_up(dim, 128)
    if aligned <= cap:
        return aligned, aligned
    for t in range(cap, 127, -128):
        if aligned % t == 0:
            return t, aligned
    return 128, aligned  # unreachable: 128 always divides `aligned`


def _fc_kernel(inv_x_ref, x_ref, w_ref, o_ref, acc_ref, wss_ref):
    """One (i, j, k) grid step of out = (inv_x * x) @ (inv_w * fc).T.

    inv_x_ref: (TM, 1)  f32 precomputed 1/max(||x row||, eps) (or ones)
    x_ref    : (TM, TK) x tile   (rows = batch,   cols = hidden slice)
    w_ref    : (TN, TK) fc tile  (rows = classes, cols = hidden slice)
    o_ref    : (TM, TN) output tile
    acc_ref  : f32 (TM, TN) matmul accumulator                        (scratch)
    wss_ref  : f32 (8, TN)  running ||fc row||^2 in lane layout       (scratch)
    """
    k = pl.program_id(2)

    @pl.when(k == 0)
    def _():
        acc_ref[...] = jnp.zeros_like(acc_ref)
        wss_ref[...] = jnp.zeros_like(wss_ref)

    x = x_ref[...]   # native dtype feeds the MXU directly (bf16 stays bf16)
    w = w_ref[...]

    # Raw x @ fc.T on the MXU; contract dim 1 of both operands so the weight
    # tile is never transposed/copied in VMEM.
    acc_ref[...] += lax.dot_general(
        x, w, (((1,), (1,)), ((), ())), preferred_element_type=jnp.float32)

    # Running sum-of-squares of fc rows, produced directly in lane (output
    # column) layout by a tiny 8-row ones @ (w*w)^T matmul; native-dtype square
    # (no full-tile f32 cast), f32 MXU accumulation. ~8/TM of the main matmul.
    w_sq = w * w
    ones_rows = jnp.ones((8, w.shape[1]), dtype=w.dtype)
    wss_ref[...] += lax.dot_general(
        ones_rows, w_sq, (((1,), (1,)), ((), ())),
        preferred_element_type=jnp.float32)

    @pl.when(k == pl.num_programs(2) - 1)
    def _():
        # F.normalize: v / max(||v||, eps) == v * rsqrt(max(||v||^2, eps^2)).
        # NOTE: padded (all-zero) rows/cols get inv_norm ~ 1e12, but they only
        # multiply exactly-zero accumulator entries (zero padding), so the
        # region trimmed by the wrapper never contaminates valid outputs.
        inv_w = lax.rsqrt(jnp.maximum(wss_ref[0:1, :], _EPS * _EPS))     # (1, TN)
        o_ref[...] = (acc_ref[...] * inv_w * inv_x_ref[...]).astype(o_ref.dtype)


def fc_module_forward(x, fc, normalize_feat=True, *,
                      tm_cap=512, tn_cap=1024, tk_cap=2048):
    """Pallas TPU forward of FC_module.

    x : [B, H] features, fc : [C, H] class weights; returns [B, C].
    """
    B, H = x.shape
    C, H2 = fc.shape
    assert H == H2, "hidden dims must match"

    if fc.dtype != x.dtype:
        fc = fc.astype(x.dtype)
    out_dtype = x.dtype
    in_itemsize = jnp.dtype(x.dtype).itemsize
    out_itemsize = jnp.dtype(out_dtype).itemsize

    # Precompute the x-row inverse norms outside the kernel (x is tiny vs fc);
    # this removes a full-tile cast + cross-lane reduce from every grid step.
    if normalize_feat:
        xf = x.astype(jnp.float32)
        inv_x = lax.rsqrt(
            jnp.maximum(jnp.sum(xf * xf, axis=1, keepdims=True), _EPS * _EPS))
    else:
        inv_x = jnp.ones((B, 1), jnp.float32)

    # Tile selection: tm spans the whole padded batch when it fits (grid_i == 1
    # -> fc streams from HBM exactly once); tn/tk prefer divisors of the
    # 128-aligned dims so fc is not copied through jnp.pad.
    B_al = _round_up(B, 128)
    if B_al <= tm_cap:
        tm, B_pad = B_al, B_al
    else:
        tm, B_pad = tm_cap, _round_up(B, tm_cap)
    tn, C_pad = _pick_tile_n(C, tn_cap, 256)
    tk, H_pad = _pick_tile_k(H, tk_cap)

    if (B_pad, H_pad) != (B, H):
        x = jnp.pad(x, ((0, B_pad - B), (0, H_pad - H)))
    if (C_pad, H_pad) != (C, H):
        fc = jnp.pad(fc, ((0, C_pad - C), (0, H_pad - H)))
    if B_pad != B:
        inv_x = jnp.pad(inv_x, ((0, B_pad - B), (0, 0)))

    grid = (B_pad // tm, C_pad // tn, H_pad // tk)
    gi, gj, gk = grid

    # Double-buffered input/output tiles + scratch. Raise v5e's 16 MiB scoped
    # default, but cap at v7x's 64 MiB physical VMEM.
    vmem_need = (2 * (tm * tk + tn * tk) * in_itemsize
                 + 2 * tm * tn * out_itemsize
                 + tm * tn * 4 + 8 * tn * 4 + 2 * tm * 4)
    vmem_limit = int(min(64 * 1024 * 1024,
                         max(32 * 1024 * 1024, (vmem_need * 5) // 4)))

    cost = pl.CostEstimate(
        flops=2 * B_pad * C_pad * H_pad + 2 * 8 * C_pad * H_pad * gi,
        transcendentals=C_pad * gi,
        bytes_accessed=(B_pad * H_pad * in_itemsize * gj      # x re-read per j
                        + C_pad * H_pad * in_itemsize * gi    # fc re-read per i
                        + B_pad * C_pad * out_itemsize
                        + B_pad * 4),
    )

    out = pl.pallas_call(
        _fc_kernel,
        out_shape=jax.ShapeDtypeStruct((B_pad, C_pad), out_dtype),
        grid_spec=pltpu.PrefetchScalarGridSpec(
            num_scalar_prefetch=0,
            grid=grid,
            in_specs=[
                pl.BlockSpec((tm, 1), lambda i, j, k: (i, 0)),    # inv ||x row||
                pl.BlockSpec((tm, tk), lambda i, j, k: (i, k)),   # x tile
                pl.BlockSpec((tn, tk), lambda i, j, k: (j, k)),   # fc tile
            ],
            out_specs=pl.BlockSpec((tm, tn), lambda i, j, k: (i, j)),
            scratch_shapes=[
                pltpu.VMEM((tm, tn), jnp.float32),   # matmul accumulator
                pltpu.VMEM((8, tn), jnp.float32),    # ||fc row||^2 (lane layout)
            ],
        ),
        compiler_params=pltpu.CompilerParams(
            dimension_semantics=("parallel", "parallel", "arbitrary"),
            vmem_limit_bytes=vmem_limit),
        cost_estimate=cost,
    )(inv_x, x, fc)

    if (B_pad, C_pad) != (B, C):
        out = out[:B, :C]
    return out


def _reference_forward(x, fc, normalize_feat=True):
    # pure-JAX reference matching the PyTorch semantics
    xf = x.astype(jnp.float32)
    wf = fc.astype(jnp.float32)
    wn = wf / jnp.maximum(jnp.linalg.norm(wf, axis=1, keepdims=True), _EPS)
    if normalize_feat:
        xf = xf / jnp.maximum(jnp.linalg.norm(xf, axis=1, keepdims=True), _EPS)
    return jnp.matmul(xf, wn.T, precision=jax.lax.Precision.HIGHEST).astype(x.dtype)


if __name__ == "__main__":
    # FC_module(hidden, n_class, ...): fc ~ Normal(0, 0.01), shape (n_class, hidden)
    hidden = 32
    n_class = 16
    batch = 8

    key = jax.random.PRNGKey(0)
    kx, kfc = jax.random.split(key)
    x = jax.random.normal(kx, (batch, hidden), dtype=jnp.float32)
    fc = 0.01 * jax.random.normal(kfc, (n_class, hidden), dtype=jnp.float32)

    out = jax.block_until_ready(fc_module_forward(x, fc, normalize_feat=True))
    out_nn = jax.block_until_ready(fc_module_forward(x, fc, normalize_feat=False))

    ref = _reference_forward(x, fc, normalize_feat=True)
    ref_nn = _reference_forward(x, fc, normalize_feat=False)

    assert out.shape == (batch, n_class)
    assert out_nn.shape == (batch, n_class)
    assert jnp.allclose(out, ref, atol=1e-4, rtol=1e-4)
    assert jnp.allclose(out_nn, ref_nn, atol=1e-4, rtol=1e-4)

    print("KERNEL_OK")
</pallas_src>

<mosaic_0001>
module attributes {stable_mosaic.version = 11 : i64} {
  func.func @_fc_kernel(%arg0: i32, %arg1: i32, %arg2: i32, %arg3: memref<128x1xf32, #tpu.memory_space<vmem>>, %arg4: memref<128x128xf32, #tpu.memory_space<vmem>>, %arg5: memref<128x128xf32, #tpu.memory_space<vmem>>, %arg6: memref<128x128xf32, #tpu.memory_space<vmem>>, %arg7: memref<128x128xf32, #tpu.memory_space<vmem>>, %arg8: memref<8x128xf32, #tpu.memory_space<vmem>>) attributes {dimension_semantics = [#tpu.dimension_semantics<parallel>, #tpu.dimension_semantics<parallel>, #tpu.dimension_semantics<arbitrary>], iteration_bounds = array<i64: 1, 1, 1>, scalar_prefetch = 0 : i64, scratch_operands = 2 : i64, tpu.core_type = #tpu.core_type<tc>, window_params = [{transform_indices = @transform_0, window_bounds = array<i64: 128, 1>}, {transform_indices = @transform_1, window_bounds = array<i64: 128, 128>}, {transform_indices = @transform_2, window_bounds = array<i64: 128, 128>}, {transform_indices = @transform_3, window_bounds = array<i64: 128, 128>}]} {
    %c0_i32 = arith.constant 0 : i32
    %0 = arith.cmpi eq, %arg2, %c0_i32 : i32
    %1 = arith.extui %0 : i1 to i32
    %c0_i32_0 = arith.constant 0 : i32
    %2 = arith.cmpi ne, %1, %c0_i32_0 : i32
    scf.if %2 {
      %cst_16 = arith.constant 0.000000e+00 : f32
      %18 = vector.broadcast %cst_16 : f32 to vector<128x128xf32>
      %c0_17 = arith.constant 0 : index
      %c0_18 = arith.constant 0 : index
      %19 = vector.load %arg7[%c0_17, %c0_18] : memref<128x128xf32, #tpu.memory_space<vmem>>, vector<128x128xf32>
      tpu.vector_store %arg7[%c0_17, %c0_18], %18 {strides = array<i32>} : memref<128x128xf32, #tpu.memory_space<vmem>>, vector<128x128xf32>,
      %cst_19 = arith.constant 0.000000e+00 : f32
      %20 = vector.broadcast %cst_19 : f32 to vector<8x128xf32>
      %c0_20 = arith.constant 0 : index
      %c0_21 = arith.constant 0 : index
      %21 = vector.load %arg8[%c0_20, %c0_21] : memref<8x128xf32, #tpu.memory_space<vmem>>, vector<8x128xf32>
      tpu.vector_store %arg8[%c0_20, %c0_21], %20 {strides = array<i32>} : memref<8x128xf32, #tpu.memory_space<vmem>>, vector<8x128xf32>,
    } else {
    }
    %c0 = arith.constant 0 : index
    %c0_1 = arith.constant 0 : index
    %3 = vector.load %arg4[%c0, %c0_1] : memref<128x128xf32, #tpu.memory_space<vmem>>, vector<128x128xf32>
    %c0_2 = arith.constant 0 : index
    %c0_3 = arith.constant 0 : index
    %4 = vector.load %arg5[%c0_2, %c0_3] : memref<128x128xf32, #tpu.memory_space<vmem>>, vector<128x128xf32>
    %c0_4 = arith.constant 0 : index
    %c0_5 = arith.constant 0 : index
    %5 = vector.load %arg7[%c0_4, %c0_5] : memref<128x128xf32, #tpu.memory_space<vmem>>, vector<128x128xf32>
    %cst = arith.constant dense<0.000000e+00> : vector<128x128xf32>
    %6 = tpu.matmul %3, %4, %cst {dimension_numbers = #tpu.dot_dimension_numbers<[1], [1], [0], [0], [0, 0, 1, 0], [], []>} : vector<128x128xf32>, vector<128x128xf32>, vector<128x128xf32> -> vector<128x128xf32>
    %7 = arith.addf %5, %6 : vector<128x128xf32>
    %c0_6 = arith.constant 0 : index
    %c0_7 = arith.constant 0 : index
    %8 = vector.load %arg7[%c0_6, %c0_7] : memref<128x128xf32, #tpu.memory_space<vmem>>, vector<128x128xf32>
    tpu.vector_store %arg7[%c0_6, %c0_7], %7 {strides = array<i32>} : memref<128x128xf32, #tpu.memory_space<vmem>>, vector<128x128xf32>,
    %9 = arith.mulf %4, %4 : vector<128x128xf32>
    %cst_8 = arith.constant 1.000000e+00 : f32
    %10 = vector.broadcast %cst_8 : f32 to vector<8x128xf32>
    %c0_9 = arith.constant 0 : index
    %c0_10 = arith.constant 0 : index
    %11 = vector.load %arg8[%c0_9, %c0_10] : memref<8x128xf32, #tpu.memory_space<vmem>>, vector<8x128xf32>
    %cst_11 = arith.constant dense<0.000000e+00> : vector<8x128xf32>
    %12 = tpu.matmul %10, %9, %cst_11 {dimension_numbers = #tpu.dot_dimension_numbers<[1], [1], [0], [0], [0, 0, 1, 0], [], []>} : vector<8x128xf32>, vector<128x128xf32>, vector<8x128xf32> -> vector<8x128xf32>
    %13 = arith.addf %11, %12 : vector<8x128xf32>
    %c0_12 = arith.constant 0 : index
    %c0_13 = arith.constant 0 : index
    %14 = vector.load %arg8[%c0_12, %c0_13] : memref<8x128xf32, #tpu.memory_space<vmem>>, vector<8x128xf32>
    tpu.vector_store %arg8[%c0_12, %c0_13], %13 {strides = array<i32>} : memref<8x128xf32, #tpu.memory_space<vmem>>, vector<8x128xf32>,
    %c0_i32_14 = arith.constant 0 : i32
    %15 = arith.cmpi eq, %arg2, %c0_i32_14 : i32
    %16 = arith.extui %15 : i1 to i32
    %c0_i32_15 = arith.constant 0 : i32
    %17 = arith.cmpi ne, %16, %c0_i32_15 : i32
    scf.if %17 {
      %c0_16 = arith.constant 0 : index
      %c0_17 = arith.constant 0 : index
      %18 = vector.load %arg8[%c0_16, %c0_17] : memref<8x128xf32, #tpu.memory_space<vmem>>, vector<1x128xf32>
      %cst_18 = arith.constant 1.000000e-24 : f32
      %19 = vector.broadcast %cst_18 : f32 to vector<1x128xf32>
      %20 = arith.maximumf %18, %19 : vector<1x128xf32>
      %21 = math.rsqrt %20 : vector<1x128xf32>
      %c0_19 = arith.constant 0 : index
      %c0_20 = arith.constant 0 : index
      %22 = vector.load %arg7[%c0_19, %c0_20] : memref<128x128xf32, #tpu.memory_space<vmem>>, vector<128x128xf32>
      %23 = vector.broadcast %21 : vector<1x128xf32> to vector<128x128xf32>
      %24 = arith.mulf %22, %23 : vector<128x128xf32>
      %c0_21 = arith.constant 0 : index
      %c0_22 = arith.constant 0 : index
      %25 = vector.load %arg3[%c0_21, %c0_22] : memref<128x1xf32, #tpu.memory_space<vmem>>, vector<128x1xf32>
      %26 = vector.broadcast %25 : vector<128x1xf32> to vector<128x128xf32>
      %27 = arith.mulf %24, %26 : vector<128x128xf32>
      %c0_23 = arith.constant 0 : index
      %c0_24 = arith.constant 0 : index
      %28 = vector.load %arg6[%c0_23, %c0_24] : memref<128x128xf32, #tpu.memory_space<vmem>>, vector<128x128xf32>
      tpu.vector_store %arg6[%c0_23, %c0_24], %27 {strides = array<i32>} : memref<128x128xf32, #tpu.memory_space<vmem>>, vector<128x128xf32>,
    } else {
    }
    return
  }
  func.func @transform_0(%arg0: i32, %arg1: i32, %arg2: i32) -> (i32, i32) {
    %c0_i32 = arith.constant 0 : i32
    %c0_i32_0 = arith.constant 0 : i32
    return %arg0, %c0_i32 : i32, i32
  }
  func.func @transform_1(%arg0: i32, %arg1: i32, %arg2: i32) -> (i32, i32) {
    %c0_i32 = arith.constant 0 : i32
    return %arg0, %arg2 : i32, i32
  }
  func.func @transform_2(%arg0: i32, %arg1: i32, %arg2: i32) -> (i32, i32) {
    %c0_i32 = arith.constant 0 : i32
    return %arg1, %arg2 : i32, i32
  }
  func.func @transform_3(%arg0: i32, %arg1: i32, %arg2: i32) -> (i32, i32) {
    %c0_i32 = arith.constant 0 : i32
    return %arg0, %arg1 : i32, i32
  }
}

</mosaic_0001>

<bundles_post_ra>
// kernel: tpu_custom_call.1
= control target key start
LH: loop header
LB: loop body
LE: loop exit
PB: predicated region body
PF: predicated region fallthrough
CT: control target
= control target key end

     0   :  { %8 = vsyncpa [#allocation5], 0  ;;  %s664_s0 = inlined_call_operand.vmem [shape: f32[128,1], index: 0, kind: input, shape index: {}]   ;;  %s665_s1 = inlined_call_operand.vmem [shape: f32[128,128], index: 1, kind: input, shape index: {}]   ;;  %s666_s2 = inlined_call_operand.hbm [shape: f32[128,128], index: 2, kind: input, shape index: {}]   ;;  %s667_s3 = inlined_call_operand.hbm [shape: f32[128,128], index: 3, kind: output, shape index: {}]  }
   0x1   :  { %9 = vsyncpa [#allocation6], 0  ;;  %s18_s14 = sshll.u32 %s666_s2, 4  ;;  %s527_s15 = smov [#allocation4]   ;;  %s19_s14 = int_to_ptr.hbm [resolvable:$true] %s18_s14 }
   0x2   :  { %s20_s16 = sshll.u32 %s527_s15, 4  ;;  %s528_s17 = smov 128   ;;  %s21_s16 = int_to_ptr.vmem [resolvable:$true] %s20_s16 }
   0x3   :  { %s529_s18 = smov 8  }
   0x4   :  { %26 = dma.hbm_to_vmem [thread:$0]  %s19_s14, 2048, %s21_s16, [#allocation5], %s528_s17, %s528_s17, %s529_s18  }
   0x5   :  { %523 = dma.done.wait [#allocation5], 2048  }
   0x6   :  { %524 = vsyncadd [#allocation5], 4294965248  ;;  %v83_v0 = vld [vmem:[#allocation4 + $0x78] sm:$0xff]  ;;  %v82_v1 = vld [vmem:[#allocation4 + $0x70] sm:$0xff]  ;;  %v530_v16 = vmov 0   ;;  %v531_v47 = vmov 1.0  }
   0x7   :  { %431 = vmatpush.xpose.msra.mxu2 %v83_v0  ;;  %432 = vmatpush.xpose.msra.mxu3 %v83_v0  ;;  %v212_v2 = vmul.f32 %v83_v0, %v83_v0  ;;  %v211_v3 = vmul.f32 %v82_v1, %v82_v1  ;;  %v81_v4 = vld [vmem:[#allocation4 + $0x68] sm:$0xff]  ;;  %v80_v6 = vld [vmem:[#allocation4 + $0x60] sm:$0xff]  ;;  %v79_v8 = vld [vmem:[#allocation4 + $0x58] sm:$0xff]  ;;  %s418_s5 = sshll.u32 %s667_s3, 4  ;;  %s419_s5 = int_to_ptr.hbm [resolvable:$true] %s418_s5 }
   0x8   :  { %100 = vmatpush.xpose.msra.mxu0 %v83_v0  ;;  %v210_v5 = vmul.f32 %v81_v4, %v81_v4  ;;  %v209_v7 = vmul.f32 %v80_v6, %v80_v6  ;;  %v208_v9 = vmul.f32 %v79_v8, %v79_v8  ;;  %v78_v10 = vld [vmem:[#allocation4 + $0x50] sm:$0xff]  ;;  %v77_v12 = vld [vmem:[#allocation4 + $0x48] sm:$0xff]  ;;  %v76_v14 = vld [vmem:[#allocation4 + $0x40] sm:$0xff]  ;;  %470 = vset.pattern.permute.xlu0 %v530_v16 }
   0x9   :  { %214 = vmatpush.xpose.msra.mxu1 %v212_v2  ;;  %v207_v11 = vmul.f32 %v78_v10, %v78_v10  ;;  %v206_v13 = vmul.f32 %v77_v12, %v77_v12  ;;  %v284_v15 = vld [vmem:[%s664_s0] sm:$0xff]  ;;  %v205_v17 = vmul.f32 %v76_v14, %v76_v14  ;;  %471 = vset.pattern.permute.xlu1 %v530_v16  ;;  %v74_v20 = vld [vmem:[#allocation4 + $0x30] sm:$0xff]  ;;  %v285_v21 = vld [vmem:[%s664_s0 + $0x8] sm:$0xff] }
   0xa   :  { %302 = vperm.xlu0 %470, %v284_v15   ;;  %v75_v18 = vld [vmem:[#allocation4 + $0x38] sm:$0xff]  ;;  %472 = vset.pattern.permute.xlu2 %v530_v16  ;;  %v203_v22 = vmul.f32 %v74_v20, %v74_v20  ;;  %v73_v23 = vld [vmem:[#allocation4 + $0x28] sm:$0xff]  ;;  %v72_v25 = vld [vmem:[#allocation4 + $0x20] sm:$0xff] }
   0xb   :  { %433 = vmatpush.xpose.msra.mxu2 %v82_v1  ;;  %434 = vmatpush.xpose.msra.mxu3 %v82_v1  ;;  %v204_v19 = vmul.f32 %v75_v18, %v75_v18  ;;  %v202_v24 = vmul.f32 %v73_v23, %v73_v23  ;;  %v286_v26 = vld [vmem:[%s664_s0 + $0x10] sm:$0xff]  ;;  %v201_v28 = vmul.f32 %v72_v25, %v72_v25  ;;  %v71_v29 = vld [vmem:[#allocation4 + $0x18] sm:$0xff]  ;;  %v70_v31 = vld [vmem:[#allocation4 + $0x10] sm:$0xff] }
   0xc   :  { %101 = vmatpush.xpose.msra.mxu0 %v82_v1  ;;  %v290_v27 = vld [vmem:[%s664_s0 + $0x30] sm:$0xff]  ;;  %312 = vperm.xlu1 %471, %v286_v26   ;;  %v200_v30 = vmul.f32 %v71_v29, %v71_v29  ;;  %v287_v32 = vld [vmem:[%s664_s0 + $0x18] sm:$0xff]  ;;  %v293_v33 = vld [vmem:[%s664_s0 + $0x48] sm:$0xff]  ;;  %v199_v34 = vmul.f32 %v70_v31, %v70_v31 }
   0xd   :  { %215 = vmatpush.xpose.msra.mxu1 %v211_v3  ;;  %v69_v35 = vld [vmem:[#allocation4 + $0x8] sm:$0xff]  ;;  %v68_v37 = vld [vmem:[#allocation4] sm:$0xff]  ;;  %v291_v38 = vld [vmem:[%s664_s0 + $0x38] sm:$0xff] }
   0xe   :  { %v198_v36 = vmul.f32 %v69_v35, %v69_v35  ;;  %v296_v39 = vld [vmem:[%s664_s0 + $0x60] sm:$0xff]  ;;  %v197_v40 = vmul.f32 %v68_v37, %v68_v37  ;;  %v55_v41 = vld [vmem:[%s665_s1 + $0x18] sm:$0xff]  ;;  %v294_v45 = vld [vmem:[%s664_s0 + $0x50] sm:$0xff] }
   0xf   :  { %435 = vmatpush.xpose.msra.mxu2 %v81_v4  ;;  %436 = vmatpush.xpose.msra.mxu3 %v81_v4  ;;  %v60_v42 = vld [vmem:[%s665_s1 + $0x40] sm:$0xff]  ;;  %v299_v46 = vld [vmem:[%s664_s0 + $0x78] sm:$0xff]  ;;  %v61_v49 = vld [vmem:[%s665_s1 + $0x48] sm:$0xff] }
  0x10   :  { %102 = vmatpush.xpose.msra.mxu0 %v81_v4  ;;  %v52_v43 = vld [vmem:[%s665_s1] sm:$0xff]  ;;  %v53_v50 = vld [vmem:[%s665_s1 + $0x8] sm:$0xff]  ;;  %v62_v54 = vld [vmem:[%s665_s1 + $0x50] sm:$0xff] }
  0x11   :  { %216 = vmatpush.xpose.msra.mxu1 %v210_v5  ;;  %v288_v44 = vld [vmem:[%s664_s0 + $0x20] sm:$0xff]  ;;  %v289_v51 = vld [vmem:[%s664_s0 + $0x28] sm:$0xff]  ;;  %v54_v55 = vld [vmem:[%s665_s1 + $0x10] sm:$0xff] }
  0x12   :  { %307 = vperm.xlu0 %470, %v285_v21   ;;  %322 = vperm.xlu2 %472, %v288_v44   ;;  %v56_v48 = vld [vmem:[%s665_s1 + $0x20] sm:$0xff]  ;;  %v297_v52 = vld [vmem:[%s664_s0 + $0x68] sm:$0xff]  ;;  %v58_v57 = vld [vmem:[%s665_s1 + $0x30] sm:$0xff] }
  0x13   :  { %437 = vmatpush.xpose.msra.mxu2 %v80_v6  ;;  %438 = vmatpush.xpose.msra.mxu3 %v80_v6  ;;  %v57_v53 = vld [vmem:[%s665_s1 + $0x28] sm:$0xff]  ;;  %v292_v56 = vld [vmem:[%s664_s0 + $0x40] sm:$0xff]  ;;  %v63_v58 = vld [vmem:[%s665_s1 + $0x58] sm:$0xff] }
  0x14   :  { %103 = vmatpush.xpose.msra.mxu0 %v80_v6  ;;  %317 = vperm.xlu1 %471, %v287_v32   ;;  %v295_v59 = vld [vmem:[%s664_s0 + $0x58] sm:$0xff]  ;;  %v64_v61 = vld [vmem:[%s665_s1 + $0x60] sm:$0xff]  ;;  %v298_v62 = vld [vmem:[%s664_s0 + $0x70] sm:$0xff]  ;;  %s532_s0 = smov [#allocation7]  }
  0x15   :  { %217 = vmatpush.xpose.msra.mxu1 %v209_v7  ;;  %v59_v60 = vld [vmem:[%s665_s1 + $0x38] sm:$0xff]  ;;  %v65_v63 = vld [vmem:[%s665_s1 + $0x68] sm:$0xff]  ;;  %v66_v0 = vld [vmem:[%s665_s1 + $0x70] sm:$0xff] }
  0x16   :  { %v67_v1 = vld [vmem:[%s665_s1 + $0x78] sm:$0xff]  ;;  %s416_s1 = sshll.u32 %s532_s0, 4  ;;  %s417_s1 = int_to_ptr.vmem [resolvable:$true] %s416_s1 }
  0x17   :  { %439 = vmatpush.xpose.msra.mxu2 %v79_v8  ;;  %440 = vmatpush.xpose.msra.mxu3 %v79_v8 }
  0x18   :  { %104 = vmatpush.xpose.msra.mxu0 %v79_v8 }
  0x19   :  { %218 = vmatpush.xpose.msra.mxu1 %v208_v9 }
  0x1a   :  { %332 = vperm.xlu0 %470, %v290_v27   ;;  %327 = vperm.xlu2 %472, %v289_v51  }
  0x1b   :  { %441 = vmatpush.xpose.msra.mxu2 %v78_v10  ;;  %442 = vmatpush.xpose.msra.mxu3 %v78_v10 }
  0x1c   :  { %105 = vmatpush.xpose.msra.mxu0 %v78_v10  ;;  %337 = vperm.xlu1 %471, %v291_v38  }
  0x1d   :  { %219 = vmatpush.xpose.msra.mxu1 %v207_v11 }
  0x1f   :  { %443 = vmatpush.xpose.msra.mxu2 %v77_v12  ;;  %444 = vmatpush.xpose.msra.mxu3 %v77_v12 }
  0x20   :  { %106 = vmatpush.xpose.msra.mxu0 %v77_v12 }
  0x21   :  { %220 = vmatpush.xpose.msra.mxu1 %v206_v13 }
  0x22   :  { %347 = vperm.xlu0 %470, %v293_v33   ;;  %342 = vperm.xlu2 %472, %v292_v56  }
  0x23   :  { %445 = vmatpush.xpose.msra.mxu2 %v76_v14  ;;  %446 = vmatpush.xpose.msra.mxu3 %v76_v14 }
  0x24   :  { %107 = vmatpush.xpose.msra.mxu0 %v76_v14  ;;  %352 = vperm.xlu1 %471, %v294_v45  }
  0x25   :  { %221 = vmatpush.xpose.msra.mxu1 %v205_v17 }
  0x27   :  { %447 = vmatpush.xpose.msra.mxu2 %v75_v18  ;;  %448 = vmatpush.xpose.msra.mxu3 %v75_v18 }
  0x28   :  { %108 = vmatpush.xpose.msra.mxu0 %v75_v18 }
  0x29   :  { %222 = vmatpush.xpose.msra.mxu1 %v204_v19 }
  0x2a   :  { %362 = vperm.xlu0 %470, %v296_v39   ;;  %357 = vperm.xlu2 %472, %v295_v59  }
  0x2b   :  { %449 = vmatpush.xpose.msra.mxu2 %v74_v20  ;;  %450 = vmatpush.xpose.msra.mxu3 %v74_v20 }
  0x2c   :  { %109 = vmatpush.xpose.msra.mxu0 %v74_v20  ;;  %367 = vperm.xlu1 %471, %v297_v52  }
  0x2d   :  { %223 = vmatpush.xpose.msra.mxu1 %v203_v22 }
  0x2f   :  { %451 = vmatpush.xpose.msra.mxu2 %v73_v23  ;;  %452 = vmatpush.xpose.msra.mxu3 %v73_v23 }
  0x30   :  { %110 = vmatpush.xpose.msra.mxu0 %v73_v23 }
  0x31   :  { %224 = vmatpush.xpose.msra.mxu1 %v202_v24 }
  0x32   :  { %377 = vperm.xlu0 %470, %v299_v46   ;;  %372 = vperm.xlu2 %472, %v298_v62  }
  0x33   :  { %453 = vmatpush.xpose.msra.mxu2 %v72_v25  ;;  %454 = vmatpush.xpose.msra.mxu3 %v72_v25 }
  0x34   :  { %111 = vmatpush.xpose.msra.mxu0 %v72_v25 }
  0x35   :  { %225 = vmatpush.xpose.msra.mxu1 %v201_v28 }
  0x37   :  { %455 = vmatpush.xpose.msra.mxu2 %v71_v29  ;;  %456 = vmatpush.xpose.msra.mxu3 %v71_v29 }
  0x38   :  { %112 = vmatpush.xpose.msra.mxu0 %v71_v29 }
  0x39   :  { %226 = vmatpush.xpose.msra.mxu1 %v200_v30 }
  0x3b   :  { %457 = vmatpush.xpose.msra.mxu2 %v70_v31  ;;  %458 = vmatpush.xpose.msra.mxu3 %v70_v31 }
  0x3c   :  { %113 = vmatpush.xpose.msra.mxu0 %v70_v31 }
  0x3d   :  { %227 = vmatpush.xpose.msra.mxu1 %v199_v34 }
  0x3f   :  { %459 = vmatpush.xpose.msra.mxu2 %v69_v35  ;;  %460 = vmatpush.xpose.msra.mxu3 %v69_v35 }
  0x40   :  { %114 = vmatpush.xpose.msra.mxu0 %v69_v35 }
  0x41   :  { %228 = vmatpush.xpose.msra.mxu1 %v198_v36 }
  0x43   :  { %461 = vmatpush.xpose.msra.mxu2 %v68_v37  ;;  %462 = vmatpush.xpose.msra.mxu3 %v68_v37 }
  0x44   :  { %115 = vmatpush.xpose.msra.mxu0 %v68_v37 }
  0x45   :  { %229 = vmatpush.xpose.msra.mxu1 %v197_v40 }
  0x46   :  { %125 = vmatmul.f32.vlgmr.msra.gmra.mxu2 %v55_v41  ;;  %140 = vmatmul.f32.vlgmr.msra.gmra.mxu3 %v60_v42 }
  0x47   :  { %116 = vmatmul.f32.vlgmr.msra.gmra.mxu0 %v52_v43 }
  0x48   :  { %230 = vmatmul.f32.vlgmr.msra.gmra.mxu1 %v531_v47 }
  0x4e   :  { %128 = vmatmul.f32.gmra.mxu2 %v56_v48  ;;  %143 = vmatmul.f32.gmra.mxu3 %v61_v49 }
  0x4f   :  { %119 = vmatmul.f32.gmra.mxu0 %v53_v50 }
  0x56   :  { %131 = vmatmul.f32.gmra.mxu2 %v57_v53  ;;  %146 = vmatmul.f32.gmra.mxu3 %v62_v54 }
  0x57   :  { %122 = vmatmul.f32.gmra.mxu0 %v54_v55 }
  0x5e   :  { %134 = vmatmul.f32.gmra.mxu2 %v58_v57  ;;  %149 = vmatmul.f32.gmra.mxu3 %v63_v58 }
  0x66   :  { %137 = vmatmul.f32.gmra.mxu2 %v59_v60  ;;  %152 = vmatmul.f32.gmra.mxu3 %v64_v61 }
  0x6c   :  { %v323_v8 = vpop.permute.xlu2 %322 }
  0x6e   :  { %155 = vmatmul.f32.gmra.mxu3 %v65_v63 }
  0x74   :  { %v328_v19 = vpop.permute.xlu2 %327 }
  0x76   :  { %158 = vmatmul.f32.gmra.mxu3 %v66_v0 }
  0x7c   :  { %v303_v3 = vpop.permute.xlu0 %302  ;;  %v343_v31 = vpop.permute.xlu2 %342 }
  0x7e   :  { %161 = vmatmul.f32.gmra.mxu3 %v67_v1  ;;  %v655_v6 = vpop.permute.xlu1 %312 }
  0x84   :  { %v308_v12 = vpop.permute.xlu0 %307  ;;  %v358_v57 = vpop.permute.xlu2 %357 }
  0x86   :  { %v318_v13 = vpop.permute.xlu1 %317 }
  0x8c   :  { %v333_v21 = vpop.permute.xlu0 %332 }
  0x8e   :  { %v338_v23 = vpop.permute.xlu1 %337 }
  0x94   :  { %v348_v36 = vpop.permute.xlu0 %347 }
  0x96   :  { %v353_v43 = vpop.permute.xlu1 %352 }
  0x9c   :  { %v363_v62 = vpop.permute.xlu0 %362 }
  0xc4   :  { %v117_v14 = vpop.f32.mrf.mxu0 }
  0xc5   :  { %v231_v2 = vpop.f32.mrf.mxu1 }
  0xc6   :  { %235 = vst [vmem:[#allocation3] sm:$0xff] %v231_v2 }
  0xc9   :  { %v126_v4 = vpop.f32.mrf.mxu2  ;;  %v141_v5 = vpop.f32.mrf.mxu3 }
  0xcc   :  { %v120_v25 = vpop.f32.mrf.mxu0 }
  0xcd   :  { %v239_v7 = vld [vmem:[#allocation3] sm:$0x1] }
  0xce   :  { %v240_v9 = vmax.f32 %v239_v7, 1e-24 }
  0xd0   :  { %473 = vrsqrt.f32 %v240_v9  ;;  %vm247_vm0 = vweird.f32 %v240_v9 }
  0xd1   :  { %v129_v10 = vpop.f32.mrf.mxu2  ;;  %v144_v11 = vpop.f32.mrf.mxu3 }
  0xd4   :  { %v123_v46 = vpop.f32.mrf.mxu0 }
  0xd6   :  { %v474_v15 = vpop.eup %473 }
  0xd7   :  { %v242_v16 = vmul.f32 %v474_v15, %v240_v9  ;;  %vm248_vm1 = vweird.f32 %v474_v15 }
  0xd8   :  { %vm249_vm2 = vmor %vm247_vm0, %vm248_vm1 }
  0xd9   :  { %v132_v17 = vpop.f32.mrf.mxu2  ;;  %v147_v18 = vpop.f32.mrf.mxu3  ;;  %v243_v20 = vmul.f32 %v474_v15, %v242_v16 }
  0xdb   :  { %v244_v22 = vmul.f32 0.5, %v243_v20 }
  0xdd   :  { %v245_v24 = vsub.f32 1.5, %v244_v22 }
  0xdf   :  { %v246_v26 = vmul.f32 %v474_v15, %v245_v24 }
  0xe1   :  { %v135_v27 = vpop.f32.mrf.mxu2  ;;  %v150_v28 = vpop.f32.mrf.mxu3  ;;  %v250_v29 = vsel %vm249_vm2, %v474_v15, %v246_v26 }
  0xe2   :  { %v267_v30 = vperm.slane %v250_v29, 0 }
  0xe4   :  { %v271_v32 = vmul.f32 %v267_v30, %v126_v4  ;;  %v276_v33 = vmul.f32 %v267_v30, %v141_v5  ;;  %v272_v34 = vmul.f32 %v267_v30, %v129_v10  ;;  %v277_v35 = vmul.f32 %v267_v30, %v144_v11  ;;  %v378_v11 = vpop.permute.xlu0 %377 }
  0xe5   :  { %v268_v37 = vmul.f32 %v267_v30, %v117_v14  ;;  %v273_v38 = vmul.f32 %v267_v30, %v132_v17  ;;  %v278_v42 = vmul.f32 %v267_v30, %v147_v18  ;;  %v269_v45 = vmul.f32 %v267_v30, %v120_v25 }
  0xe6   :  { %v383_v39 = vmul.f32 %v318_v13, %v271_v32  ;;  %v384_v40 = vmul.f32 %v323_v8, %v272_v34  ;;  %v389_v41 = vmul.f32 %v348_v36, %v277_v35  ;;  %v388_v44 = vmul.f32 %v343_v31, %v276_v33  ;;  %v373_v8 = vpop.permute.xlu2 %372 }
  0xe7   :  { %v380_v48 = vmul.f32 %v303_v3, %v268_v37  ;;  %v274_v49 = vmul.f32 %v267_v30, %v135_v27  ;;  %v385_v51 = vmul.f32 %v328_v19, %v273_v38  ;;  %v279_v52 = vmul.f32 %v267_v30, %v150_v28  ;;  %v368_v3 = vpop.permute.xlu1 %367 }
  0xe8   :  { %399 = vst [vmem:[#allocation7 + $0x18] sm:$0xff] %v383_v39  ;;  %v390_v53 = vmul.f32 %v353_v43, %v278_v42  ;;  %v270_v54 = vmul.f32 %v267_v30, %v123_v46  ;;  %v381_v55 = vmul.f32 %v308_v12, %v269_v45 }
  0xe9   :  { %v153_v47 = vpop.f32.mrf.mxu3  ;;  %v138_v50 = vpop.f32.mrf.mxu2  ;;  %400 = vst [vmem:[#allocation7 + $0x20] sm:$0xff] %v384_v40  ;;  %v386_v58 = vmul.f32 %v333_v21, %v274_v49  ;;  %v391_v60 = vmul.f32 %v358_v57, %v279_v52 }
  0xea   :  { %405 = vst [vmem:[#allocation7 + $0x48] sm:$0xff] %v389_v41  ;;  %v275_v56 = vmul.f32 %v267_v30, %v138_v50  ;;  %v280_v59 = vmul.f32 %v267_v30, %v153_v47  ;;  %v382_v61 = vmul.f32 %v655_v6, %v270_v54 }
  0xeb   :  { %404 = vst [vmem:[#allocation7 + $0x40] sm:$0xff] %v388_v44 }
  0xec   :  { %396 = vst [vmem:[#allocation7] sm:$0xff] %v380_v48  ;;  %v387_v63 = vmul.f32 %v338_v23, %v275_v56  ;;  %v392_v1 = vmul.f32 %v363_v62, %v280_v59 }
  0xed   :  { %401 = vst [vmem:[#allocation7 + $0x28] sm:$0xff] %v385_v51 }
  0xee   :  { %406 = vst [vmem:[#allocation7 + $0x50] sm:$0xff] %v390_v53 }
  0xef   :  { %397 = vst [vmem:[#allocation7 + $0x8] sm:$0xff] %v381_v55 }
  0xf0   :  { %402 = vst [vmem:[#allocation7 + $0x30] sm:$0xff] %v386_v58 }
  0xf1   :  { %v156_v0 = vpop.f32.mrf.mxu3  ;;  %407 = vst [vmem:[#allocation7 + $0x58] sm:$0xff] %v391_v60 }
  0xf2   :  { %v281_v2 = vmul.f32 %v267_v30, %v156_v0  ;;  %398 = vst [vmem:[#allocation7 + $0x10] sm:$0xff] %v382_v61 }
  0xf3   :  { %403 = vst [vmem:[#allocation7 + $0x38] sm:$0xff] %v387_v63 }
  0xf4   :  { %v393_v4 = vmul.f32 %v368_v3, %v281_v2  ;;  %408 = vst [vmem:[#allocation7 + $0x60] sm:$0xff] %v392_v1 }
  0xf6   :  { %409 = vst [vmem:[#allocation7 + $0x68] sm:$0xff] %v393_v4 }
  0xf9   :  { %v159_v5 = vpop.f32.mrf.mxu3 }
  0xfa   :  { %v282_v7 = vmul.f32 %v267_v30, %v159_v5 }
  0xfc   :  { %v394_v9 = vmul.f32 %v373_v8, %v282_v7 }
  0xfe   :  { %410 = vst [vmem:[#allocation7 + $0x70] sm:$0xff] %v394_v9 }
 0x101   :  { %v162_v6 = vpop.f32.mrf.mxu3 }
 0x102   :  { %v283_v10 = vmul.f32 %v267_v30, %v162_v6 }
 0x104   :  { %v395_v12 = vmul.f32 %v378_v11, %v283_v10 }
 0x106   :  { %411 = vst [vmem:[#allocation7 + $0x78] sm:$0xff] %v395_v12 }
 0x107   :  { %424 = dma.vmem_to_hbm [thread:$0]  %s417_s1, 2048, %s419_s5, [#allocation6], %s528_s17, %s528_s17, %s529_s18  }
 0x108   :  { %525 = dma.done.wait [#allocation6], 2048  }
 0x109   :  { %526 = vsyncadd [#allocation6], 4294965248 }
 0x10a   :  { %429 = vsyncpa [#allocation5], 1 }
 0x10b   :  { %430 = vsyncpa [#allocation6], 1 }

</bundles_post_ra>
